<compile_context>
chip_gen: v5e
topology: v5e:2x2
jax: 0.10.0
libtpu: 0.0.40
codegen_flags: <defaults>
</compile_context>

<pallas_src>
import jax
import jax.numpy as jnp
from jax import lax
from jax.experimental import pallas as pl
from jax.experimental.pallas import tpu as pltpu

NUM_CLASSES = 5
H_PAD = 128     # lane-dense padded width for hidden state and classifier output
B_BLOCK = 8     # sequences per grid program (one f32 vreg of sublanes)


def rnn_kernel(x_ref, wW_ref, bWU_ref, wU_ref,
               wV1_ref, bV1_ref, wV2_ref, bV2_ref, out_ref):
    # x_ref: (1, seq*B_BLOCK, input_dim); rows ordered time-major within the
    # block, i.e. row r = t*B_BLOCK + b_local.
    seq = x_ref.shape[1] // B_BLOCK

    # Hoisted input projection with bU pre-folded into the bias:
    #   xw[t*B+b] = x[b,t] @ W + (bW + bU).  Padded lanes (>= hidden) stay 0.
    xw = jnp.dot(x_ref[0], wW_ref[...],
                 preferred_element_type=jnp.float32) + bWU_ref[...]  # (seq*B, 128)

    wU = wU_ref[...]  # loop-invariant; stays resident in vregs across the loop.

    # Fully-unrolled serial recurrence: h_t = relu(xw_t + h_{t-1} @ U).
    h = jnp.zeros((B_BLOCK, H_PAD), jnp.float32)
    for t in range(seq):
        rec = jnp.dot(h, wU, preferred_element_type=jnp.float32)
        h = jnp.maximum(xw[t * B_BLOCK:(t + 1) * B_BLOCK, :] + rec, 0.0)

    # Classifier head (weights loaded at point of use to keep loop-live vreg
    # pressure low, per review).
    z1 = jnp.dot(h, wV1_ref[...],
                 preferred_element_type=jnp.float32) + bV1_ref[...]
    a1 = jnp.maximum(z1, 0.0)
    z2 = jnp.dot(a1, wV2_ref[...],
                 preferred_element_type=jnp.float32) + bV2_ref[...]   # (B, 128)
    a2 = jnp.maximum(z2, 0.0)

    # Masked log-softmax over the first NUM_CLASSES lanes (rest is padding).
    lane = lax.broadcasted_iota(jnp.int32, a2.shape, 1)
    valid = lane < NUM_CLASSES
    logits = jnp.where(valid, a2, jnp.float32(-1e30))
    m = jnp.max(logits, axis=-1, keepdims=True)
    e = jnp.where(valid, jnp.exp(logits - m), 0.0)
    s = jnp.sum(e, axis=-1, keepdims=True)
    out_ref[...] = logits - m - jnp.log(s)


def prep_params(params, input_dim, h):
    """One-time weight prep (NOT per forward): transpose every Linear weight to
    (in, out) layout, zero-pad hidden/classifier dims to 128 lanes, and fold
    bU into the projection bias (bWU = bW + bU)."""
    wW, bW, wU, bU, wV1, bV1, wV2, bV2 = params
    wW_t = jnp.zeros((input_dim, H_PAD), jnp.float32).at[:, :h].set(wW.T)
    wU_t = jnp.zeros((H_PAD, H_PAD), jnp.float32).at[:h, :h].set(wU.T)
    wV1_t = jnp.zeros((H_PAD, H_PAD), jnp.float32).at[:h, :h].set(wV1.T)
    wV2_t = jnp.zeros((H_PAD, H_PAD), jnp.float32).at[:h, :NUM_CLASSES].set(wV2.T)
    bWU_p = jnp.zeros((1, H_PAD), jnp.float32).at[0, :h].set(bW + bU)
    bV1_p = jnp.zeros((1, H_PAD), jnp.float32).at[0, :h].set(bV1)
    bV2_p = jnp.zeros((1, H_PAD), jnp.float32).at[0, :NUM_CLASSES].set(bV2)
    return (wW_t, bWU_p, wU_t, wV1_t, bV1_p, wV2_t, bV2_p)


@jax.jit
def rnn_forward(inputs, prepped):
    """inputs: (B, seq, input_dim) f32 — B independent sequences.
    Returns (B, NUM_CLASSES) log-probabilities."""
    B, seq, in_dim = inputs.shape
    nb = (B + B_BLOCK - 1) // B_BLOCK
    Bp = nb * B_BLOCK
    x = inputs
    if Bp != B:                                   # pad batch to a block multiple
        x = jnp.pad(x, ((0, Bp - B), (0, 0), (0, 0)))
    # Per-block, time-major row layout: (nb, seq*B_BLOCK, in_dim).
    x = (x.reshape(nb, B_BLOCK, seq, in_dim)
          .transpose(0, 2, 1, 3)
          .reshape(nb, seq * B_BLOCK, in_dim))

    wW, bWU, wU, wV1, bV1, wV2, bV2 = prepped

    def full(a):  # whole array, same block for every grid step (no re-DMA)
        return pl.BlockSpec(a.shape, lambda i, _nd=a.ndim: (0,) * _nd)

    out_pad = pl.pallas_call(
        rnn_kernel,
        out_shape=jax.ShapeDtypeStruct((Bp, H_PAD), jnp.float32),
        grid=(nb,),
        in_specs=[pl.BlockSpec((1, seq * B_BLOCK, in_dim), lambda i: (i, 0, 0)),
                  full(wW), full(bWU), full(wU),
                  full(wV1), full(bV1), full(wV2), full(bV2)],
        out_specs=pl.BlockSpec((B_BLOCK, H_PAD), lambda i: (i, 0)),
        compiler_params=pltpu.CompilerParams(
            dimension_semantics=("parallel",)),
    )(x, wW, bWU, wU, wV1, bV1, wV2, bV2)
    return out_pad[:B, :NUM_CLASSES]


def rnn_forward_single(inputs, prepped):
    """Original-module signature: one (seq, input_dim) sequence -> (5,) log-probs."""
    return rnn_forward(inputs[None], prepped)[0]


def init_params(key, input_dim, h):
    """Deterministic init mimicking torch.nn.Linear (uniform +-1/sqrt(fan_in))."""
    keys = jax.random.split(key, 8)

    def lin(kw, kb, fan_in, fan_out):
        bound = 1.0 / jnp.sqrt(jnp.float32(fan_in))
        w = jax.random.uniform(kw, (fan_out, fan_in), jnp.float32, -bound, bound)
        b = jax.random.uniform(kb, (fan_out,), jnp.float32, -bound, bound)
        return w, b

    wW, bW = lin(keys[0], keys[1], input_dim, h)
    wU, bU = lin(keys[2], keys[3], h, h)
    wV1, bV1 = lin(keys[4], keys[5], h, h)
    wV2, bV2 = lin(keys[6], keys[7], h, NUM_CLASSES)
    return (wW, bW, wU, bU, wV1, bV1, wV2, bV2)


def rnn_forward_ref(inputs, params):
    """Pure-JAX reference of the PyTorch forward (single sequence)."""
    wW, bW, wU, bU, wV1, bV1, wV2, bV2 = params
    prev_h = jnp.zeros((wW.shape[0],), jnp.float32)
    for t in range(inputs.shape[0]):
        prev_h = jax.nn.relu(inputs[t] @ wW.T + bW + prev_h @ wU.T + bU)
    z1 = prev_h @ wV1.T + bV1
    z2 = jax.nn.relu(z1) @ wV2.T + bV2
    return jax.nn.log_softmax(jax.nn.relu(z2))


if __name__ == "__main__":
    seq, input_dim, hidden, batch = 8, 16, 32, 16   # batch=16 -> grid=(2,)

    key = jax.random.PRNGKey(0)
    k_x, k_p = jax.random.split(key)
    inputs = jax.random.normal(k_x, (batch, seq, input_dim), jnp.float32)
    params = init_params(k_p, input_dim, hidden)

    # Weight prep done once, outside the steady-state call path.
    prepped = prep_params(params, input_dim, hidden)

    out = rnn_forward(inputs, prepped)
    out = jax.block_until_ready(out)

    ref = jnp.stack([rnn_forward_ref(inputs[b], params) for b in range(batch)])
    assert out.shape == (batch, NUM_CLASSES)
    assert jnp.allclose(out, ref, atol=1e-5, rtol=1e-5), (out, ref)

    print("KERNEL_OK")
</pallas_src>

<mosaic_0001>
module attributes {stable_mosaic.version = 11 : i64} {
  func.func @rnn_kernel(%arg0: i32, %arg1: memref<1x64x16xf32, #tpu.memory_space<vmem>>, %arg2: memref<16x128xf32, #tpu.memory_space<vmem>>, %arg3: memref<1x128xf32, #tpu.memory_space<vmem>>, %arg4: memref<128x128xf32, #tpu.memory_space<vmem>>, %arg5: memref<128x128xf32, #tpu.memory_space<vmem>>, %arg6: memref<1x128xf32, #tpu.memory_space<vmem>>, %arg7: memref<128x128xf32, #tpu.memory_space<vmem>>, %arg8: memref<1x128xf32, #tpu.memory_space<vmem>>, %arg9: memref<8x128xf32, #tpu.memory_space<vmem>>) attributes {dimension_semantics = [#tpu.dimension_semantics<parallel>], iteration_bounds = array<i64: 2>, scalar_prefetch = 0 : i64, scratch_operands = 0 : i64, tpu.core_type = #tpu.core_type<tc>, window_params = [{transform_indices = @transform_0, window_bounds = array<i64: 1, 64, 16>}, {pipeline_mode = #tpu.pipeline_mode<synchronous>, transform_indices = @transform_1, window_bounds = array<i64: 16, 128>}, {pipeline_mode = #tpu.pipeline_mode<synchronous>, transform_indices = @transform_2, window_bounds = array<i64: 1, 128>}, {pipeline_mode = #tpu.pipeline_mode<synchronous>, transform_indices = @transform_3, window_bounds = array<i64: 128, 128>}, {pipeline_mode = #tpu.pipeline_mode<synchronous>, transform_indices = @transform_4, window_bounds = array<i64: 128, 128>}, {pipeline_mode = #tpu.pipeline_mode<synchronous>, transform_indices = @transform_5, window_bounds = array<i64: 1, 128>}, {pipeline_mode = #tpu.pipeline_mode<synchronous>, transform_indices = @transform_6, window_bounds = array<i64: 128, 128>}, {pipeline_mode = #tpu.pipeline_mode<synchronous>, transform_indices = @transform_7, window_bounds = array<i64: 1, 128>}, {transform_indices = @transform_8, window_bounds = array<i64: 8, 128>}]} {
    %c0 = arith.constant 0 : index
    %c0_0 = arith.constant 0 : index
    %c0_1 = arith.constant 0 : index
    %0 = vector.load %arg1[%c0, %c0_0, %c0_1] : memref<1x64x16xf32, #tpu.memory_space<vmem>>, vector<1x64x16xf32>
    %1 = vector.shape_cast %0 : vector<1x64x16xf32> to vector<64x16xf32>
    %c0_2 = arith.constant 0 : index
    %c0_3 = arith.constant 0 : index
    %2 = vector.load %arg2[%c0_2, %c0_3] : memref<16x128xf32, #tpu.memory_space<vmem>>, vector<16x128xf32>
    %cst = arith.constant dense<0.000000e+00> : vector<64x128xf32>
    %3 = tpu.matmul %1, %2, %cst {dimension_numbers = #tpu.dot_dimension_numbers<[1], [0], [0], [1], [0, 0, 1, 1], [], []>} : vector<64x16xf32>, vector<16x128xf32>, vector<64x128xf32> -> vector<64x128xf32>
    %c0_4 = arith.constant 0 : index
    %c0_5 = arith.constant 0 : index
    %4 = vector.load %arg3[%c0_4, %c0_5] : memref<1x128xf32, #tpu.memory_space<vmem>>, vector<1x128xf32>
    %5 = vector.broadcast %4 : vector<1x128xf32> to vector<64x128xf32>
    %6 = arith.addf %3, %5 : vector<64x128xf32>
    %c0_6 = arith.constant 0 : index
    %c0_7 = arith.constant 0 : index
    %7 = vector.load %arg4[%c0_6, %c0_7] : memref<128x128xf32, #tpu.memory_space<vmem>>, vector<128x128xf32>
    %cst_8 = arith.constant 0.000000e+00 : f32
    %8 = vector.broadcast %cst_8 : f32 to vector<8x128xf32>
    %cst_9 = arith.constant dense<0.000000e+00> : vector<8x128xf32>
    %9 = tpu.matmul %8, %7, %cst_9 {dimension_numbers = #tpu.dot_dimension_numbers<[1], [0], [0], [1], [0, 0, 1, 1], [], []>} : vector<8x128xf32>, vector<128x128xf32>, vector<8x128xf32> -> vector<8x128xf32>
    %10 = vector.extract_strided_slice %6 {offsets = [0, 0], sizes = [8, 128], strides = [1, 1]} : vector<64x128xf32> to vector<8x128xf32>
    %11 = arith.addf %10, %9 : vector<8x128xf32>
    %cst_10 = arith.constant 0.000000e+00 : f32
    %12 = vector.broadcast %cst_10 : f32 to vector<8x128xf32>
    %13 = arith.maximumf %11, %12 : vector<8x128xf32>
    %cst_11 = arith.constant dense<0.000000e+00> : vector<8x128xf32>
    %14 = tpu.matmul %13, %7, %cst_11 {dimension_numbers = #tpu.dot_dimension_numbers<[1], [0], [0], [1], [0, 0, 1, 1], [], []>} : vector<8x128xf32>, vector<128x128xf32>, vector<8x128xf32> -> vector<8x128xf32>
    %15 = vector.extract_strided_slice %6 {offsets = [8, 0], sizes = [8, 128], strides = [1, 1]} : vector<64x128xf32> to vector<8x128xf32>
    %16 = arith.addf %15, %14 : vector<8x128xf32>
    %cst_12 = arith.constant 0.000000e+00 : f32
    %17 = vector.broadcast %cst_12 : f32 to vector<8x128xf32>
    %18 = arith.maximumf %16, %17 : vector<8x128xf32>
    %cst_13 = arith.constant dense<0.000000e+00> : vector<8x128xf32>
    %19 = tpu.matmul %18, %7, %cst_13 {dimension_numbers = #tpu.dot_dimension_numbers<[1], [0], [0], [1], [0, 0, 1, 1], [], []>} : vector<8x128xf32>, vector<128x128xf32>, vector<8x128xf32> -> vector<8x128xf32>
    %20 = vector.extract_strided_slice %6 {offsets = [16, 0], sizes = [8, 128], strides = [1, 1]} : vector<64x128xf32> to vector<8x128xf32>
    %21 = arith.addf %20, %19 : vector<8x128xf32>
    %cst_14 = arith.constant 0.000000e+00 : f32
    %22 = vector.broadcast %cst_14 : f32 to vector<8x128xf32>
    %23 = arith.maximumf %21, %22 : vector<8x128xf32>
    %cst_15 = arith.constant dense<0.000000e+00> : vector<8x128xf32>
    %24 = tpu.matmul %23, %7, %cst_15 {dimension_numbers = #tpu.dot_dimension_numbers<[1], [0], [0], [1], [0, 0, 1, 1], [], []>} : vector<8x128xf32>, vector<128x128xf32>, vector<8x128xf32> -> vector<8x128xf32>
    %25 = vector.extract_strided_slice %6 {offsets = [24, 0], sizes = [8, 128], strides = [1, 1]} : vector<64x128xf32> to vector<8x128xf32>
    %26 = arith.addf %25, %24 : vector<8x128xf32>
    %cst_16 = arith.constant 0.000000e+00 : f32
    %27 = vector.broadcast %cst_16 : f32 to vector<8x128xf32>
    %28 = arith.maximumf %26, %27 : vector<8x128xf32>
    %cst_17 = arith.constant dense<0.000000e+00> : vector<8x128xf32>
    %29 = tpu.matmul %28, %7, %cst_17 {dimension_numbers = #tpu.dot_dimension_numbers<[1], [0], [0], [1], [0, 0, 1, 1], [], []>} : vector<8x128xf32>, vector<128x128xf32>, vector<8x128xf32> -> vector<8x128xf32>
    %30 = vector.extract_strided_slice %6 {offsets = [32, 0], sizes = [8, 128], strides = [1, 1]} : vector<64x128xf32> to vector<8x128xf32>
    %31 = arith.addf %30, %29 : vector<8x128xf32>
    %cst_18 = arith.constant 0.000000e+00 : f32
    %32 = vector.broadcast %cst_18 : f32 to vector<8x128xf32>
    %33 = arith.maximumf %31, %32 : vector<8x128xf32>
    %cst_19 = arith.constant dense<0.000000e+00> : vector<8x128xf32>
    %34 = tpu.matmul %33, %7, %cst_19 {dimension_numbers = #tpu.dot_dimension_numbers<[1], [0], [0], [1], [0, 0, 1, 1], [], []>} : vector<8x128xf32>, vector<128x128xf32>, vector<8x128xf32> -> vector<8x128xf32>
    %35 = vector.extract_strided_slice %6 {offsets = [40, 0], sizes = [8, 128], strides = [1, 1]} : vector<64x128xf32> to vector<8x128xf32>
    %36 = arith.addf %35, %34 : vector<8x128xf32>
    %cst_20 = arith.constant 0.000000e+00 : f32
    %37 = vector.broadcast %cst_20 : f32 to vector<8x128xf32>
    %38 = arith.maximumf %36, %37 : vector<8x128xf32>
    %cst_21 = arith.constant dense<0.000000e+00> : vector<8x128xf32>
    %39 = tpu.matmul %38, %7, %cst_21 {dimension_numbers = #tpu.dot_dimension_numbers<[1], [0], [0], [1], [0, 0, 1, 1], [], []>} : vector<8x128xf32>, vector<128x128xf32>, vector<8x128xf32> -> vector<8x128xf32>
    %40 = vector.extract_strided_slice %6 {offsets = [48, 0], sizes = [8, 128], strides = [1, 1]} : vector<64x128xf32> to vector<8x128xf32>
    %41 = arith.addf %40, %39 : vector<8x128xf32>
    %cst_22 = arith.constant 0.000000e+00 : f32
    %42 = vector.broadcast %cst_22 : f32 to vector<8x128xf32>
    %43 = arith.maximumf %41, %42 : vector<8x128xf32>
    %cst_23 = arith.constant dense<0.000000e+00> : vector<8x128xf32>
    %44 = tpu.matmul %43, %7, %cst_23 {dimension_numbers = #tpu.dot_dimension_numbers<[1], [0], [0], [1], [0, 0, 1, 1], [], []>} : vector<8x128xf32>, vector<128x128xf32>, vector<8x128xf32> -> vector<8x128xf32>
    %45 = vector.extract_strided_slice %6 {offsets = [56, 0], sizes = [8, 128], strides = [1, 1]} : vector<64x128xf32> to vector<8x128xf32>
    %46 = arith.addf %45, %44 : vector<8x128xf32>
    %cst_24 = arith.constant 0.000000e+00 : f32
    %47 = vector.broadcast %cst_24 : f32 to vector<8x128xf32>
    %48 = arith.maximumf %46, %47 : vector<8x128xf32>
    %c0_25 = arith.constant 0 : index
    %c0_26 = arith.constant 0 : index
    %49 = vector.load %arg5[%c0_25, %c0_26] : memref<128x128xf32, #tpu.memory_space<vmem>>, vector<128x128xf32>
    %cst_27 = arith.constant dense<0.000000e+00> : vector<8x128xf32>
    %50 = tpu.matmul %48, %49, %cst_27 {dimension_numbers = #tpu.dot_dimension_numbers<[1], [0], [0], [1], [0, 0, 1, 1], [], []>} : vector<8x128xf32>, vector<128x128xf32>, vector<8x128xf32> -> vector<8x128xf32>
    %c0_28 = arith.constant 0 : index
    %c0_29 = arith.constant 0 : index
    %51 = vector.load %arg6[%c0_28, %c0_29] : memref<1x128xf32, #tpu.memory_space<vmem>>, vector<1x128xf32>
    %52 = vector.broadcast %51 : vector<1x128xf32> to vector<8x128xf32>
    %53 = arith.addf %50, %52 : vector<8x128xf32>
    %cst_30 = arith.constant 0.000000e+00 : f32
    %54 = vector.broadcast %cst_30 : f32 to vector<8x128xf32>
    %55 = arith.maximumf %53, %54 : vector<8x128xf32>
    %c0_31 = arith.constant 0 : index
    %c0_32 = arith.constant 0 : index
    %56 = vector.load %arg7[%c0_31, %c0_32] : memref<128x128xf32, #tpu.memory_space<vmem>>, vector<128x128xf32>
    %cst_33 = arith.constant dense<0.000000e+00> : vector<8x128xf32>
    %57 = tpu.matmul %55, %56, %cst_33 {dimension_numbers = #tpu.dot_dimension_numbers<[1], [0], [0], [1], [0, 0, 1, 1], [], []>} : vector<8x128xf32>, vector<128x128xf32>, vector<8x128xf32> -> vector<8x128xf32>
    %c0_34 = arith.constant 0 : index
    %c0_35 = arith.constant 0 : index
    %58 = vector.load %arg8[%c0_34, %c0_35] : memref<1x128xf32, #tpu.memory_space<vmem>>, vector<1x128xf32>
    %59 = vector.broadcast %58 : vector<1x128xf32> to vector<8x128xf32>
    %60 = arith.addf %57, %59 : vector<8x128xf32>
    %cst_36 = arith.constant 0.000000e+00 : f32
    %61 = vector.broadcast %cst_36 : f32 to vector<8x128xf32>
    %62 = arith.maximumf %60, %61 : vector<8x128xf32>
    %63 = tpu.iota {dimensions = array<i32: 1>} : vector<8x128xi32>
    %c5_i32 = arith.constant 5 : i32
    %64 = vector.broadcast %c5_i32 : i32 to vector<8x128xi32>
    %65 = arith.cmpi slt, %63, %64 : vector<8x128xi32>
    %cst_37 = arith.constant -1.000000e+30 : f32
    %66 = vector.broadcast %cst_37 : f32 to vector<8x128xf32>
    %67 = arith.select %65, %62, %66 : vector<8x128xi1>, vector<8x128xf32>
    %cst_38 = arith.constant dense<0xFF800000> : vector<8xf32>
    %68 = vector.multi_reduction <maximumf>, %67, %cst_38 [1] : vector<8x128xf32> to vector<8xf32>
    %69 = vector.shape_cast %68 : vector<8xf32> to vector<8x1xf32>
    %70 = vector.broadcast %69 : vector<8x1xf32> to vector<8x128xf32>
    %71 = arith.subf %67, %70 : vector<8x128xf32>
    %72 = math.exp %71 : vector<8x128xf32>
    %cst_39 = arith.constant 0.000000e+00 : f32
    %73 = vector.broadcast %cst_39 : f32 to vector<8x128xf32>
    %74 = arith.select %65, %72, %73 : vector<8x128xi1>, vector<8x128xf32>
    %cst_40 = arith.constant dense<0.000000e+00> : vector<8xf32>
    %75 = vector.multi_reduction <add>, %74, %cst_40 [1] : vector<8x128xf32> to vector<8xf32>
    %76 = vector.shape_cast %75 : vector<8xf32> to vector<8x1xf32>
    %77 = vector.broadcast %69 : vector<8x1xf32> to vector<8x128xf32>
    %78 = arith.subf %67, %77 : vector<8x128xf32>
    %79 = math.log %76 : vector<8x1xf32>
    %80 = vector.broadcast %79 : vector<8x1xf32> to vector<8x128xf32>
    %81 = arith.subf %78, %80 : vector<8x128xf32>
    %c0_41 = arith.constant 0 : index
    %c0_42 = arith.constant 0 : index
    %82 = vector.load %arg9[%c0_41, %c0_42] : memref<8x128xf32, #tpu.memory_space<vmem>>, vector<8x128xf32>
    tpu.vector_store %arg9[%c0_41, %c0_42], %81 {strides = array<i32>} : memref<8x128xf32, #tpu.memory_space<vmem>>, vector<8x128xf32>,
    return
  }
  func.func @transform_0(%arg0: i32) -> (i32, i32, i32) {
    %c0_i32 = arith.constant 0 : i32
    %c0_i32_0 = arith.constant 0 : i32
    %c0_i32_1 = arith.constant 0 : i32
    return %arg0, %c0_i32, %c0_i32_0 : i32, i32, i32
  }
  func.func @transform_1(%arg0: i32) -> (i32, i32) {
    %c0_i32 = arith.constant 0 : i32
    %c0_i32_0 = arith.constant 0 : i32
    %c0_i32_1 = arith.constant 0 : i32
    return %c0_i32, %c0_i32_0 : i32, i32
  }
  func.func @transform_2(%arg0: i32) -> (i32, i32) {
    %c0_i32 = arith.constant 0 : i32
    %c0_i32_0 = arith.constant 0 : i32
    %c0_i32_1 = arith.constant 0 : i32
    return %c0_i32, %c0_i32_0 : i32, i32
  }
  func.func @transform_3(%arg0: i32) -> (i32, i32) {
    %c0_i32 = arith.constant 0 : i32
    %c0_i32_0 = arith.constant 0 : i32
    %c0_i32_1 = arith.constant 0 : i32
    return %c0_i32, %c0_i32_0 : i32, i32
  }
  func.func @transform_4(%arg0: i32) -> (i32, i32) {
    %c0_i32 = arith.constant 0 : i32
    %c0_i32_0 = arith.constant 0 : i32
    %c0_i32_1 = arith.constant 0 : i32
    return %c0_i32, %c0_i32_0 : i32, i32
  }
  func.func @transform_5(%arg0: i32) -> (i32, i32) {
    %c0_i32 = arith.constant 0 : i32
    %c0_i32_0 = arith.constant 0 : i32
    %c0_i32_1 = arith.constant 0 : i32
    return %c0_i32, %c0_i32_0 : i32, i32
  }
  func.func @transform_6(%arg0: i32) -> (i32, i32) {
    %c0_i32 = arith.constant 0 : i32
    %c0_i32_0 = arith.constant 0 : i32
    %c0_i32_1 = arith.constant 0 : i32
    return %c0_i32, %c0_i32_0 : i32, i32
  }
  func.func @transform_7(%arg0: i32) -> (i32, i32) {
    %c0_i32 = arith.constant 0 : i32
    %c0_i32_0 = arith.constant 0 : i32
    %c0_i32_1 = arith.constant 0 : i32
    return %c0_i32, %c0_i32_0 : i32, i32
  }
  func.func @transform_8(%arg0: i32) -> (i32, i32) {
    %c0_i32 = arith.constant 0 : i32
    %c0_i32_0 = arith.constant 0 : i32
    return %arg0, %c0_i32 : i32, i32
  }
}

</mosaic_0001>

<bundles_post_ra>
// kernel: rnn_forward.1
= control target key start
LH: loop header
LB: loop body
LE: loop exit
PB: predicated region body
PF: predicated region fallthrough
CT: control target
= control target key end

     0   :  { %13 = vsyncpa [#allocation3], 0  ;;  %s1304_s0 = inlined_call_operand.vmem [shape: f32[2,64,16], index: 0, kind: input, shape index: {}]   ;;  %s1305_s1 = inlined_call_operand.hbm [shape: f32[16,128], index: 1, kind: input, shape index: {}]   ;;  %s1306_s2 = inlined_call_operand.vmem [shape: f32[1,128], index: 2, kind: input, shape index: {}]   ;;  %s1307_s3 = inlined_call_operand.vmem [shape: f32[128,128], index: 3, kind: input, shape index: {}]   ;;  %s1308_s4 = inlined_call_operand.vmem [shape: f32[128,128], index: 4, kind: input, shape index: {}]   ;;  %s1309_s5 = inlined_call_operand.vmem [shape: f32[1,128], index: 5, kind: input, shape index: {}]   ;;  %s1310_s6 = inlined_call_operand.hbm [shape: f32[128,128], index: 6, kind: input, shape index: {}]   ;;  %s1311_s7 = inlined_call_operand.vmem [shape: f32[1,128], index: 7, kind: input, shape index: {}]   ;;  %s1312_s8 = inlined_call_operand.vmem [shape: f32[16,128], index: 8, kind: output, shape index: {}]  }
   0x1   :  { %14 = vsyncpa [#allocation5], 0  ;;  %s971_s27 = smov 0  }
   0x2 LB: > { %s235_s30 = sshll.u32 %s1305_s1, 4  ;;  %s783_s9 = sadd.s32 4294967295, %s919_s27   ;;  %s919_s27 = sphi %s971_s27, %s20_s27   ;;  %s236_s30 = int_to_ptr.hbm [resolvable:$true] %s235_s30 }
   0x3   : > { %p785_p0 = scmp.ge.s32.totalorder %s919_s27, 1  ;;  %p224_p1 = scmp.lt.s32.totalorder %s919_s27, 3 }
   0x4   : > { %p821_p2 = scmp.eq.s32.totalorder %s783_s9, 0  ;;  %s921_s11 = smov [#allocation2]  }
   0x5   : > { %p982_p3 = pnand %p785_p0, %p224_p1  ;;  %s237_s12 = sshll.u32 %s921_s11, 4  ;;  %s238_s12 = int_to_ptr.vmem [resolvable:$true] %s237_s12 }
   0x6   : > { %s261_s15 = sshll.u32 %s1310_s6, 4  ;;  %s922_s16 = smov [#allocation4]   ;;  %s262_s15 = int_to_ptr.hbm [resolvable:$true] %s261_s15 }
   0x7   : > { %p814_p4 = pneg %p982_p3  ;;  %s263_s17 = sshll.u32 %s922_s16, 4  ;;  %s264_s17 = int_to_ptr.vmem [resolvable:$true] %s263_s17 }
   0x8   : > { %s923_s18 = smov 128   ;;  %s924_s19 = smov 8  }
   0x9   : > { %p815_p5 = pnand %p821_p2, %p814_p4  ;;  %290 = sbr.rel (%p982_p3) target bundleno = 1642 (0x66a), region = 52 }
   0xb   : > { %817 = dma.hbm_to_vmem [thread:$0]  (!%p815_p5), %s236_s30, 256, %s238_s12, [#allocation3], %s923_s18, %s923_s18, %s924_s19  }
   0xc   : > { %820 = dma.hbm_to_vmem [thread:$0]  (!%p815_p5), %s262_s15, 2048, %s264_s17, [#allocation5], %s923_s18, %s923_s18, %s924_s19  }
   0xe   : > { %910 = dma.done.wait (%p821_p2), [#allocation3], 256  }
   0xf   : > { %912 = vsyncadd (%p821_p2), [#allocation3], 4294967040 }
  0x10   : > { %914 = dma.done.wait (%p821_p2), [#allocation5], 2048  }
  0x11   : > { %916 = vsyncadd (%p821_p2), [#allocation5], 4294965248  ;;  %p329_p6 = scmp.lt.s32.totalorder %s783_s9, 1  ;;  %v1004_v0 = vld [vmem:[%s1307_s3 + $0x78] sm:$0xff]  ;;  %v1009_v1 = vld [vmem:[%s1307_s3 + $0x70] sm:$0xff]  ;;  %vm352_vm0 = vcmask 130048  }
  0x12   : > { %434 = vmatpush.msra.mxu1 %v1004_v0  ;;  %456 = vmatpush.msra.mxu2 %v1004_v0  ;;  %v1016_v2 = vld [vmem:[%s1307_s3 + $0x68] sm:$0xff]  ;;  %v1029_v3 = vld [vmem:[%s1307_s3 + $0x60] sm:$0xff]  ;;  %v1037_v7 = vld [vmem:[%s1307_s3 + $0x58] sm:$0xff]  ;;  %v925_v19 = vmov 0.0  }
  0x13   : > { %s1315_s9 = smov (!%p329_p6, %s783_s9), 1  ;;  %478 = vmatpush.msra.mxu3 %v1004_v0  ;;  %v347_v4 = vld [vmem:[#allocation2 + $0x8] sm:$0xff]  ;;  %v346_v5 = vld [vmem:[#allocation2] sm:$0xff]  ;;  %v1045_v8 = vld [vmem:[%s1307_s3 + $0x50] sm:$0xff] }
  0x14   : > { %s805_s20 = sshll.u32 %s1315_s9, 6  ;;  %435 = vmatpush.msra.mxu1 %v1009_v1  ;;  %457 = vmatpush.msra.mxu2 %v1009_v1  ;;  %v1054_v9 = vld [vmem:[%s1307_s3 + $0x48] sm:$0xff]  ;;  %v1063_v10 = vld [vmem:[%s1307_s3 + $0x40] sm:$0xff]  ;;  %v1072_v11 = vld [vmem:[%s1307_s3 + $0x38] sm:$0xff]  ;;  %s794_s15 = sshll.u32 %s1315_s9, 3 }
  0x15   : > { %s1021_s30 = scalar_lea.vmem %s1304_s0, %s805_s20  ;;  %479 = vmatpush.msra.mxu3 %v1009_v1  ;;  %391 = vmatpush.msra.mxu0 %v347_v4  ;;  %v1081_v12 = vld [vmem:[%s1307_s3 + $0x30] sm:$0xff]  ;;  %v1090_v13 = vld [vmem:[%s1307_s3 + $0x28] sm:$0xff]  ;;  %v1099_v14 = vld [vmem:[%s1307_s3 + $0x20] sm:$0xff]  ;;  %s337_s18 = scalar_lea.vmem %s1312_s8, %s794_s15 }
  0x16   : > { %436 = vmatpush.msra.mxu1 %v1016_v2  ;;  %v338_v6 = vld [vmem:[%s1021_s30] sm:$0xff]  ;;  %458 = vmatpush.msra.mxu2 %v1016_v2  ;;  %v1108_v15 = vld [vmem:[%s1307_s3 + $0x18] sm:$0xff]  ;;  %v1117_v16 = vld [vmem:[%s1307_s3 + $0x10] sm:$0xff] }
  0x17   : > { %480 = vmatpush.msra.mxu3 %v1016_v2  ;;  %392 = vmatpush.msra.mxu0 %v346_v5  ;;  %v1126_v17 = vld [vmem:[%s1307_s3 + $0x8] sm:$0xff]  ;;  %v1135_v18 = vld [vmem:[%s1307_s3] sm:$0xff]  ;;  %v340_v27 = vld [vmem:[%s1021_s30 + $0x10] sm:$0xff] }
  0x18   : > { %437 = vmatpush.msra.mxu1 %v1029_v3  ;;  %795 = vmatmul.msk.f32.vlgmr.msra.gmra.mxu0 %vm352_vm0, %v338_v6  ;;  %v339_v20 = vld [vmem:[%s1021_s30 + $0x8] sm:$0xff]  ;;  %v1221_v21 = vld [vmem:[%s1306_s2] ss:$0 sm:$0xff]  ;;  %v341_v33 = vld [vmem:[%s1021_s30 + $0x18] sm:$0xff] }
  0x19   : > { %459 = vmatpush.msra.mxu2 %v1029_v3  ;;  %481 = vmatpush.msra.mxu3 %v1029_v3  ;;  %v342_v39 = vld [vmem:[%s1021_s30 + $0x20] sm:$0xff]  ;;  %v343_v45 = vld [vmem:[%s1021_s30 + $0x28] sm:$0xff]  ;;  %v344_v46 = vld [vmem:[%s1021_s30 + $0x30] sm:$0xff] }
  0x1a   : > { %438 = vmatpush.msra.mxu1 %v1037_v7  ;;  %566 = vmatpush.msrb.mxu0 %v1004_v0  ;;  %v345_v47 = vld [vmem:[%s1021_s30 + $0x38] sm:$0xff]  ;;  %v624_v59 = vld [vmem:[%s1308_s4 + $0x70] sm:$0xff]  ;;  %v623_v60 = vld [vmem:[%s1308_s4 + $0x68] sm:$0xff] }
  0x1b   : > { %460 = vmatpush.msra.mxu2 %v1037_v7  ;;  %482 = vmatpush.msra.mxu3 %v1037_v7  ;;  %v625_v58 = vld [vmem:[%s1308_s4 + $0x78] sm:$0xff]  ;;  %v622_v61 = vld [vmem:[%s1308_s4 + $0x60] sm:$0xff]  ;;  %v616_v4 = vld [vmem:[%s1308_s4 + $0x30] sm:$0xff] }
  0x1c   : > { %439 = vmatpush.msra.mxu1 %v1045_v8  ;;  %567 = vmatpush.msrb.mxu0 %v1009_v1  ;;  %v621_v62 = vld [vmem:[%s1308_s4 + $0x58] sm:$0xff]  ;;  %v615_v6 = vld [vmem:[%s1308_s4 + $0x28] sm:$0xff] }
  0x1d   : > { %461 = vmatpush.msra.mxu2 %v1045_v8  ;;  %483 = vmatpush.msra.mxu3 %v1045_v8 }
  0x1e   : > { %440 = vmatpush.msra.mxu1 %v1054_v9  ;;  %568 = vmatpush.msrb.mxu0 %v1016_v2 }
  0x1f   : > { %462 = vmatpush.msra.mxu2 %v1054_v9  ;;  %484 = vmatpush.msra.mxu3 %v1054_v9 }
  0x20   : > { %441 = vmatpush.msra.mxu1 %v1063_v10  ;;  %569 = vmatpush.msrb.mxu0 %v1029_v3 }
  0x21   : > { %463 = vmatpush.msra.mxu2 %v1063_v10  ;;  %485 = vmatpush.msra.mxu3 %v1063_v10 }
  0x22   : > { %442 = vmatpush.msra.mxu1 %v1072_v11  ;;  %570 = vmatpush.msrb.mxu0 %v1037_v7 }
  0x23   : > { %464 = vmatpush.msra.mxu2 %v1072_v11  ;;  %486 = vmatpush.msra.mxu3 %v1072_v11 }
  0x24   : > { %443 = vmatpush.msra.mxu1 %v1081_v12  ;;  %571 = vmatpush.msrb.mxu0 %v1045_v8 }
  0x25   : > { %465 = vmatpush.msra.mxu2 %v1081_v12  ;;  %487 = vmatpush.msra.mxu3 %v1081_v12 }
  0x26   : > { %444 = vmatpush.msra.mxu1 %v1090_v13  ;;  %572 = vmatpush.msrb.mxu0 %v1054_v9 }
  0x27   : > { %466 = vmatpush.msra.mxu2 %v1090_v13  ;;  %488 = vmatpush.msra.mxu3 %v1090_v13 }
  0x28   : > { %445 = vmatpush.msra.mxu1 %v1099_v14  ;;  %573 = vmatpush.msrb.mxu0 %v1063_v10 }
  0x29   : > { %467 = vmatpush.msra.mxu2 %v1099_v14  ;;  %489 = vmatpush.msra.mxu3 %v1099_v14 }
  0x2a   : > { %446 = vmatpush.msra.mxu1 %v1108_v15  ;;  %574 = vmatpush.msrb.mxu0 %v1072_v11 }
  0x2b   : > { %468 = vmatpush.msra.mxu2 %v1108_v15  ;;  %490 = vmatpush.msra.mxu3 %v1108_v15 }
  0x2c   : > { %447 = vmatpush.msra.mxu1 %v1117_v16  ;;  %575 = vmatpush.msrb.mxu0 %v1081_v12 }
  0x2d   : > { %469 = vmatpush.msra.mxu2 %v1117_v16  ;;  %491 = vmatpush.msra.mxu3 %v1117_v16 }
  0x2e   : > { %448 = vmatpush.msra.mxu1 %v1126_v17  ;;  %576 = vmatpush.msrb.mxu0 %v1090_v13 }
  0x2f   : > { %470 = vmatpush.msra.mxu2 %v1126_v17  ;;  %492 = vmatpush.msra.mxu3 %v1126_v17 }
  0x30   : > { %449 = vmatpush.msra.mxu1 %v1135_v18  ;;  %577 = vmatpush.msrb.mxu0 %v1099_v14 }
  0x31   : > { %450 = vmatmul.f32.vlgmr.msra.gmra.mxu1 %v925_v19  ;;  %471 = vmatpush.msra.mxu2 %v1135_v18  ;;  %v663_v19 = vld [vmem:[#allocation4 + $0x60] sm:$0xff] }
  0x32   : > { %493 = vmatpush.msra.mxu3 %v1135_v18  ;;  %500 = vmatpush.msrb.mxu1 %v1004_v0 }
  0x33   : > { %522 = vmatpush.msrb.mxu2 %v1004_v0  ;;  %578 = vmatpush.msrb.mxu0 %v1108_v15 }
  0x34   : > { %544 = vmatpush.msrb.mxu3 %v1004_v0  ;;  %501 = vmatpush.msrb.mxu1 %v1009_v1 }
  0x35   : > { %523 = vmatpush.msrb.mxu2 %v1009_v1  ;;  %579 = vmatpush.msrb.mxu0 %v1117_v16 }
  0x36   : > { %545 = vmatpush.msrb.mxu3 %v1009_v1  ;;  %502 = vmatpush.msrb.mxu1 %v1016_v2 }
  0x37   : > { %524 = vmatpush.msrb.mxu2 %v1016_v2  ;;  %580 = vmatpush.msrb.mxu0 %v1126_v17 }
  0x38   : > { %546 = vmatpush.msrb.mxu3 %v1016_v2  ;;  %503 = vmatpush.msrb.mxu1 %v1029_v3 }
  0x39   : > { %525 = vmatpush.msrb.mxu2 %v1029_v3  ;;  %581 = vmatpush.msrb.mxu0 %v1135_v18 }
  0x3a   : > { %547 = vmatpush.msrb.mxu3 %v1029_v3  ;;  %504 = vmatpush.msrb.mxu1 %v1037_v7 }
  0x3b   : > { %526 = vmatpush.msrb.mxu2 %v1037_v7  ;;  %796 = vmatmul.msk.f32.gmra.mxu0 %vm352_vm0, %v339_v20  ;;  %v662_v20 = vld [vmem:[#allocation4 + $0x58] sm:$0xff] }
  0x3c   : > { %548 = vmatpush.msrb.mxu3 %v1037_v7  ;;  %505 = vmatpush.msrb.mxu1 %v1045_v8 }
  0x3d   : > { %527 = vmatpush.msrb.mxu2 %v1045_v8 }
  0x3e   : > { %549 = vmatpush.msrb.mxu3 %v1045_v8  ;;  %506 = vmatpush.msrb.mxu1 %v1054_v9 }
  0x3f   : > { %528 = vmatpush.msrb.mxu2 %v1054_v9 }
  0x40   : > { %550 = vmatpush.msrb.mxu3 %v1054_v9  ;;  %507 = vmatpush.msrb.mxu1 %v1063_v10 }
  0x41   : > { %529 = vmatpush.msrb.mxu2 %v1063_v10 }
  0x42   : > { %551 = vmatpush.msrb.mxu3 %v1063_v10  ;;  %508 = vmatpush.msrb.mxu1 %v1072_v11 }
  0x43   : > { %530 = vmatpush.msrb.mxu2 %v1072_v11  ;;  %797 = vmatmul.msk.f32.gmra.mxu0 %vm352_vm0, %v340_v27  ;;  %v656_v27 = vld [vmem:[#allocation4 + $0x28] sm:$0xff] }
  0x44   : > { %552 = vmatpush.msrb.mxu3 %v1072_v11  ;;  %509 = vmatpush.msrb.mxu1 %v1081_v12 }
  0x45   : > { %531 = vmatpush.msrb.mxu2 %v1081_v12 }
  0x46   : > { %553 = vmatpush.msrb.mxu3 %v1081_v12  ;;  %510 = vmatpush.msrb.mxu1 %v1090_v13 }
  0x47   : > { %532 = vmatpush.msrb.mxu2 %v1090_v13 }
  0x48   : > { %554 = vmatpush.msrb.mxu3 %v1090_v13  ;;  %511 = vmatpush.msrb.mxu1 %v1099_v14 }
  0x49   : > { %533 = vmatpush.msrb.mxu2 %v1099_v14 }
  0x4a   : > { %555 = vmatpush.msrb.mxu3 %v1099_v14  ;;  %512 = vmatpush.msrb.mxu1 %v1108_v15 }
  0x4b   : > { %534 = vmatpush.msrb.mxu2 %v1108_v15  ;;  %798 = vmatmul.msk.f32.gmra.mxu0 %vm352_vm0, %v341_v33 }
  0x4c   : > { %556 = vmatpush.msrb.mxu3 %v1108_v15  ;;  %513 = vmatpush.msrb.mxu1 %v1117_v16 }
  0x4d   : > { %535 = vmatpush.msrb.mxu2 %v1117_v16 }
  0x4e   : > { %557 = vmatpush.msrb.mxu3 %v1117_v16  ;;  %514 = vmatpush.msrb.mxu1 %v1126_v17 }
  0x4f   : > { %536 = vmatpush.msrb.mxu2 %v1126_v17 }
  0x50   : > { %558 = vmatpush.msrb.mxu3 %v1126_v17  ;;  %515 = vmatpush.msrb.mxu1 %v1135_v18 }
  0x51   : > { %537 = vmatpush.msrb.mxu2 %v1135_v18 }
  0x52   : > { %559 = vmatpush.msrb.mxu3 %v1135_v18  ;;  %588 = vmatpush.msra.mxu1 %v1004_v0  ;;  %v620_v0 = vld [vmem:[%s1308_s4 + $0x50] sm:$0xff] }
  0x53   : > { %799 = vmatmul.msk.f32.gmra.mxu0 %vm352_vm0, %v342_v39 }
  0x54   : > { %589 = vmatpush.msra.mxu1 %v1009_v1  ;;  %v619_v1 = vld [vmem:[%s1308_s4 + $0x48] sm:$0xff] }
  0x56   : > { %590 = vmatpush.msra.mxu1 %v1016_v2  ;;  %v618_v2 = vld [vmem:[%s1308_s4 + $0x40] sm:$0xff] }
  0x58   : > { %591 = vmatpush.msra.mxu1 %v1029_v3  ;;  %v617_v3 = vld [vmem:[%s1308_s4 + $0x38] sm:$0xff] }
  0x5a   : > { %592 = vmatpush.msra.mxu1 %v1037_v7  ;;  %v614_v7 = vld [vmem:[%s1308_s4 + $0x20] sm:$0xff] }
  0x5b   : > { %800 = vmatmul.msk.f32.gmra.mxu0 %vm352_vm0, %v343_v45 }
  0x5c   : > { %593 = vmatpush.msra.mxu1 %v1045_v8  ;;  %v613_v8 = vld [vmem:[%s1308_s4 + $0x18] sm:$0xff] }
  0x5e   : > { %594 = vmatpush.msra.mxu1 %v1054_v9 }
  0x60   : > { %595 = vmatpush.msra.mxu1 %v1063_v10 }
  0x62   : > { %596 = vmatpush.msra.mxu1 %v1072_v11 }
  0x63   : > { %801 = vmatmul.msk.f32.gmra.mxu0 %vm352_vm0, %v344_v46 }
  0x64   : > { %597 = vmatpush.msra.mxu1 %v1081_v12 }
  0x66   : > { %598 = vmatpush.msra.mxu1 %v1090_v13  ;;  %v612_v13 = vld [vmem:[%s1308_s4 + $0x10] sm:$0xff] }
  0x68   : > { %599 = vmatpush.msra.mxu1 %v1099_v14  ;;  %v611_v14 = vld [vmem:[%s1308_s4 + $0x8] sm:$0xff] }
  0x6a   : > { %600 = vmatpush.msra.mxu1 %v1108_v15  ;;  %v610_v15 = vld [vmem:[%s1308_s4] sm:$0xff] }
  0x6b   : > { %802 = vmatmul.msk.f32.gmra.mxu0 %vm352_vm0, %v345_v47 }
  0x6c   : > { %601 = vmatpush.msra.mxu1 %v1117_v16  ;;  %v666_v16 = vld [vmem:[#allocation4 + $0x78] sm:$0xff] }
  0x6e   : > { %602 = vmatpush.msra.mxu1 %v1126_v17  ;;  %v665_v17 = vld [vmem:[#allocation4 + $0x70] sm:$0xff] }
  0x70   : > { %603 = vmatpush.msra.mxu1 %v1135_v18  ;;  %v664_v18 = vld [vmem:[#allocation4 + $0x68] sm:$0xff] }
  0x95   : > { %v394_v22 = vpop.f32.mrf.mxu0 }
  0x96   : > { %v395_v23 = vadd.f32 %v1221_v21, %v394_v22  ;;  %v661_v22 = vld [vmem:[#allocation4 + $0x50] sm:$0xff] }
  0xae   : > { %v451_v24 = vpop.f32.mrf.mxu1 }
  0xaf   : > { %v454_v25 = vadd.f32 %v451_v24, %v395_v23  ;;  %v660_v23 = vld [vmem:[#allocation4 + $0x48] sm:$0xff]  ;;  %v659_v24 = vld [vmem:[#allocation4 + $0x40] sm:$0xff] }
  0xb1   : > { %v455_v26 = vmax.f32 %v454_v25, 0.0  ;;  %v658_v25 = vld [vmem:[#allocation4 + $0x38] sm:$0xff] }
  0xb3   : > { %472 = vmatmul.f32.vlgmr.msra.gmra.mxu2 %v455_v26  ;;  %v657_v26 = vld [vmem:[#allocation4 + $0x30] sm:$0xff] }
  0xb4   : > { %630 = vmatpush.msra.mxu2 %v625_v58 }
  0xb6   : > { %631 = vmatpush.msra.mxu2 %v624_v59 }
  0xb8   : > { %v397_v28 = vpop.f32.mrf.mxu0  ;;  %632 = vmatpush.msra.mxu2 %v623_v60 }
  0xb9   : > { %v398_v29 = vadd.f32 %v1221_v21, %v397_v28  ;;  %v655_v28 = vld [vmem:[#allocation4 + $0x20] sm:$0xff] }
  0xba   : > { %633 = vmatpush.msra.mxu2 %v622_v61 }
  0xbc   : > { %634 = vmatpush.msra.mxu2 %v621_v62 }
  0xbe   : > { %635 = vmatpush.msra.mxu2 %v620_v0 }
  0xc0   : > { %v400_v34 = vpop.f32.mrf.mxu0  ;;  %636 = vmatpush.msra.mxu2 %v619_v1 }
  0xc1   : > { %v401_v35 = vadd.f32 %v1221_v21, %v400_v34  ;;  %v653_v34 = vld [vmem:[#allocation4 + $0x10] sm:$0xff] }
  0xc2   : > { %637 = vmatpush.msra.mxu2 %v618_v2 }
  0xc4   : > { %638 = vmatpush.msra.mxu2 %v617_v3 }
  0xc6   : > { %639 = vmatpush.msra.mxu2 %v616_v4 }
  0xc8   : > { %v403_v40 = vpop.f32.mrf.mxu0  ;;  %640 = vmatpush.msra.mxu2 %v615_v6 }
  0xc9   : > { %v404_v41 = vadd.f32 %v1221_v21, %v403_v40 }
  0xca   : > { %641 = vmatpush.msra.mxu2 %v614_v7 }
  0xcc   : > { %642 = vmatpush.msra.mxu2 %v613_v8 }
  0xce   : > { %643 = vmatpush.msra.mxu2 %v612_v13 }
  0xd0   : > { %v406_v48 = vpop.f32.mrf.mxu0  ;;  %644 = vmatpush.msra.mxu2 %v611_v14 }
  0xd1   : > { %v407_v49 = vadd.f32 %v1221_v21, %v406_v48 }
  0xd2   : > { %645 = vmatpush.msra.mxu2 %v610_v15 }
  0xd8   : > { %v409_v53 = vpop.f32.mrf.mxu0 }
  0xd9   : > { %v410_v54 = vadd.f32 %v1221_v21, %v409_v53 }
  0xe0   : > { %v412_v63 = vpop.f32.mrf.mxu0 }
  0xe1   : > { %v413_v9 = vadd.f32 %v1221_v21, %v412_v63 }
  0xe8   : > { %v415_v5 = vpop.f32.mrf.mxu0 }
 0x136   : > { %v473_v30 = vpop.f32.mrf.mxu2 }
 0x137   : > { %v476_v31 = vadd.f32 %v473_v30, %v398_v29  ;;  %v654_v29 = vld [vmem:[#allocation4 + $0x18] sm:$0xff]  ;;  %v416_v30 = vadd.f32 %v1221_v21, %v415_v5  ;;  %v840_v21 = vld [vmem:[%s1311_s7] ss:$0 sm:$0xff] }
 0x139   : > { %v477_v32 = vmax.f32 %v476_v31, 0.0 }
 0x13b   : > { %494 = vmatmul.f32.vlgmr.msra.gmra.mxu3 %v477_v32 }
 0x13c   : > { %671 = vmatpush.msra.mxu3 %v666_v16 }
 0x13e   : > { %672 = vmatpush.msra.mxu3 %v665_v17 }
 0x140   : > { %673 = vmatpush.msra.mxu3 %v664_v18 }
 0x142   : > { %674 = vmatpush.msra.mxu3 %v663_v19 }
 0x144   : > { %675 = vmatpush.msra.mxu3 %v662_v20 }
 0x146   : > { %676 = vmatpush.msra.mxu3 %v661_v22 }
 0x148   : > { %677 = vmatpush.msra.mxu3 %v660_v23 }
 0x14a   : > { %678 = vmatpush.msra.mxu3 %v659_v24 }
 0x14c   : > { %679 = vmatpush.msra.mxu3 %v658_v25 }
 0x14e   : > { %680 = vmatpush.msra.mxu3 %v657_v26 }
 0x150   : > { %681 = vmatpush.msra.mxu3 %v656_v27 }
 0x152   : > { %682 = vmatpush.msra.mxu3 %v655_v28 }
 0x154   : > { %683 = vmatpush.msra.mxu3 %v654_v29 }
 0x156   : > { %684 = vmatpush.msra.mxu3 %v653_v34 }
 0x1be   : > { %v495_v36 = vpop.f32.mrf.mxu3 }
 0x1bf   : > { %v498_v37 = vadd.f32 %v495_v36, %v401_v35  ;;  %v652_v35 = vld [vmem:[#allocation4 + $0x8] sm:$0xff]  ;;  %v651_v36 = vld [vmem:[#allocation4] sm:$0xff] }
 0x1c0   : > { %685 = vmatpush.msra.mxu3 %v652_v35 }
 0x1c1   : > { %v499_v38 = vmax.f32 %v498_v37, 0.0  ;;  %v839_v37 = vld [vmem:[%s1309_s5] ss:$0 sm:$0xff] }
 0x1c2   : > { %686 = vmatpush.msra.mxu3 %v651_v36 }
 0x1c3   : > { %516 = vmatmul.f32.vlgmr.msrb.gmra.mxu1 %v499_v38 }
 0x240   : > { %v517_v42 = vpop.f32.mrf.mxu1 }
 0x241   : > { %v520_v43 = vadd.f32 %v517_v42, %v404_v41  ;;  %v692_v41 = vlaneseq }
 0x243   : > { %v521_v44 = vmax.f32 %v520_v43, 0.0  ;;  %v693_v42 = vand.u32 127, %v692_v41 }
 0x245   : > { %538 = vmatmul.f32.vlgmr.msrb.gmra.mxu2 %v521_v44  ;;  %vm694_vm1 = vcmp.lt.s32.totalorder %v693_v42, 5 }
 0x2c8   : > { %v539_v50 = vpop.f32.mrf.mxu2 }
 0x2c9   : > { %v542_v51 = vadd.f32 %v539_v50, %v407_v49 }
 0x2cb   : > { %v543_v52 = vmax.f32 %v542_v51, 0.0 }
 0x2cd   : > { %560 = vmatmul.f32.vlgmr.msrb.gmra.mxu3 %v543_v52 }
 0x350   : > { %v561_v55 = vpop.f32.mrf.mxu3 }
 0x351   : > { %v564_v56 = vadd.f32 %v561_v55, %v410_v54 }
 0x353   : > { %v565_v57 = vmax.f32 %v564_v56, 0.0 }
 0x355   : > { %582 = vmatmul.f32.vlgmr.msrb.gmra.mxu0 %v565_v57 }
 0x3d2   : > { %v583_v10 = vpop.f32.mrf.mxu0 }
 0x3d3   : > { %v586_v11 = vadd.f32 %v583_v10, %v413_v9 }
 0x3d5   : > { %v587_v12 = vmax.f32 %v586_v11, 0.0 }
 0x3d7   : > { %604 = vmatmul.f32.vlgmr.msra.gmra.mxu1 %v587_v12 }
 0x454   : > { %v605_v31 = vpop.f32.mrf.mxu1 }
 0x455   : > { %v608_v32 = vadd.f32 %v605_v31, %v416_v30 }
 0x457   : > { %v609_v33 = vmax.f32 %v608_v32, 0.0 }
 0x459   : > { %646 = vmatmul.f32.vlgmr.msra.gmra.mxu2 %v609_v33 }
 0x4dc   : > { %v647_v38 = vpop.f32.mrf.mxu2 }
 0x4dd   : > { %v648_v39 = vadd.f32 %v839_v37, %v647_v38 }
 0x4df   : > { %v650_v40 = vmax.f32 %v648_v39, 0.0 }
 0x4e1   : > { %687 = vmatmul.f32.vlgmr.msra.gmra.mxu3 %v650_v40 }
 0x564   : > { %v688_v43 = vpop.f32.mrf.mxu3 }
 0x565   : > { %v689_v44 = vadd.f32 %v840_v21, %v688_v43 }
 0x567   : > { %v691_v45 = vmax.f32 %v689_v44, 0.0 }
 0x569   : > { %v695_v46 = vsel %vm694_vm1, %v691_v45, -1e+30 }
 0x56a   : > { %696 = vmax.xlane.f32.xlu0 %v695_v46 }
 0x5dd   : > { %v697_v47 = vpop.xlane.xlu0 %696 }
 0x5de   : > { %v698_v48 = vsub.f32 %v695_v46, %v697_v47 }
 0x5e0   : > { %v699_v49 = vmul.f32 1.442695, %v698_v48 }
 0x5e2   : > { %841 = vpow2.f32 %v699_v49 }
 0x5e8   : > { %v842_v50 = vpop.eup %841 }
 0x5e9   : > { %v701_v51 = vsel %vm694_vm1, %v842_v50, 0.0 }
 0x5ea   : > { %702 = vadd.xlane.f32.xlu0 %v701_v51 }
 0x65d   : > { %v703_v52 = vpop.xlane.xlu0 %702 }
 0x65e   : > { %843 = vlog2.f32 %v703_v52 }
 0x664   : > { %v844_v53 = vpop.eup %843 }
 0x665   : > { %v705_v54 = vmul.f32 0.6931472, %v844_v53 }
 0x667   : > { %v706_v55 = vsub.f32 %v698_v48, %v705_v54 }
 0x669   : > { %707 = vst [vmem:[%s337_s18] sm:$0xff] %v706_v55 }
 0x66a PF: > { %s20_s27 = sadd.s32 1, %s919_s27  }
 0x66b   : > { %p17_p7 = scmp.ge.s32.totalorder %s20_s27, 4  }
 0x66d   :  { %19 = sbr.rel (!%p17_p7) target bundleno = 2 (0x2), region = 91 }
 0x672   :  { %727 = vsyncpa [#allocation3], 1 }
 0x673   :  { %729 = vsyncpa [#allocation3 + $0x1], 1 }
 0x674   :  { %730 = vsyncpa [#allocation5], 1 }

</bundles_post_ra>
